<compile_context>
chip_gen: v7x
topology: tpu7x:2x2x1
jax: 0.10.0
libtpu: 0.0.40
codegen_flags: <defaults>
</compile_context>

<pallas_src>
import jax
import jax.numpy as jnp
from jax.experimental import pallas as pl
from jax.experimental.pallas import tpu as pltpu


def _round_up(x, m):
    return ((x + m - 1) // m) * m


def ensemble_kernel(x_ref,
                    wf_ref, bf_ref,          # fused [model_1 | model_2] weights / biases
                    wc1_ref, bc1_ref,        # classifier Linear(n_inputs, 256)
                    wc2_ref, bc2_ref,        # classifier Linear(256, 128)
                    wc3_ref, bc3_ref,        # classifier Linear(128, n_outputs_padded)
                    out_ref):
    cd = wf_ref.dtype  # compute dtype for MXU operands (bf16 by default)

    x = x_ref[...]  # native dtype; cast only at the dot boundary

    # x_1 = model_1(x), x_2 = model_2(x), then torch.cat([x_1, x_2], dim=1)
    # -> single fused GEMM against the pre-concatenated weight (no in-kernel concat).
    h = jnp.dot(x.astype(cd), wf_ref[...],
                preferred_element_type=jnp.float32) + bf_ref[...]

    # classifier: ReLU -> Linear -> ReLU -> Dropout -> Linear -> ReLU -> Dropout -> Linear
    h = jnp.maximum(h, 0.0)                                                    # ReLU (f32 VPU)
    h = jnp.dot(h.astype(cd), wc1_ref[...],
                preferred_element_type=jnp.float32) + bc1_ref[...]
    h = jnp.maximum(h, 0.0)                                                    # ReLU
    # TODO(synk): nn.Dropout(p=0.4) is identity in eval mode; training-mode RNG masking not implemented.
    h = jnp.dot(h.astype(cd), wc2_ref[...],
                preferred_element_type=jnp.float32) + bc2_ref[...]
    h = jnp.maximum(h, 0.0)                                                    # ReLU
    logits = jnp.dot(h.astype(cd), wc3_ref[...],
                     preferred_element_type=jnp.float32) + bc3_ref[...]

    out_ref[...] = logits.astype(out_ref.dtype)                                # lane-dense store


def ensemble_forward(x, params, *, compute_dtype=jnp.bfloat16, tm=1024):
    """Fused forward pass, batch-tiled over a 1-D 'parallel' grid.

    tm: max rows per batch tile. 512-2048 is safe on v7x's 64 MiB VMEM;
        v6e (128 MiB) can go larger. Weights stay VMEM-resident across tiles.
    """
    B, n_features = x.shape
    n_outputs = params["wc3"].shape[1]
    hidden2 = params["wc3"].shape[0]

    # --- weight preprocessing (one-time, wrapper-side) -----------------------
    # Fuse the two sub-model GEMMs: [w1 | w2] along the output axis.
    wf = jnp.concatenate([params["w1"], params["w2"]], axis=1).astype(compute_dtype)
    bf = jnp.concatenate([params["b1"], params["b2"]], axis=1).astype(jnp.float32)
    wc1 = params["wc1"].astype(compute_dtype)
    bc1 = params["bc1"].astype(jnp.float32)
    wc2 = params["wc2"].astype(compute_dtype)
    bc2 = params["bc2"].astype(jnp.float32)

    # Lane-dense output: zero-pad the last layer to a multiple of 128 columns.
    n_out_pad = _round_up(max(n_outputs, 128), 128)
    wc3 = jnp.zeros((hidden2, n_out_pad), compute_dtype)
    wc3 = wc3.at[:, :n_outputs].set(params["wc3"].astype(compute_dtype))
    bc3 = jnp.zeros((1, n_out_pad), jnp.float32)
    bc3 = bc3.at[:, :n_outputs].set(params["bc3"].astype(jnp.float32))

    # --- batch tiling ---------------------------------------------------------
    # TM multiple of 16 (bf16 sublane packing); pad the batch so TM divides it.
    TM = min(tm, _round_up(B, 16))
    B_pad = _round_up(B, TM)
    if B_pad != B:
        x = jnp.pad(x, ((0, B_pad - B), (0, 0)))
    grid = (B_pad // TM,)

    weights = (wf, bf, wc1, bc1, wc2, bc2, wc3, bc3)

    def const_spec(a):
        return pl.BlockSpec(a.shape, lambda i: (0, 0))

    out = pl.pallas_call(
        ensemble_kernel,
        out_shape=jax.ShapeDtypeStruct((B_pad, n_out_pad), jnp.float32),
        grid=grid,
        in_specs=[pl.BlockSpec((TM, n_features), lambda i: (i, 0))]
                 + [const_spec(a) for a in weights],
        out_specs=pl.BlockSpec((TM, n_out_pad), lambda i: (i, 0)),
        compiler_params=pltpu.CompilerParams(
            dimension_semantics=("parallel",)),
    )(x, *weights)

    return out[:B, :n_outputs]


def init_params(key, n_features, feat_dim, n_outputs):
    """Deterministic f32 parameter init. model_1/model_2 are Linear(n_features, feat_dim);
    classifier follows the PyTorch module with n_inputs = 2 * feat_dim."""
    n_inputs = 2 * feat_dim
    ks = jax.random.split(key, 10)

    def w(k, shape):
        fan_in = shape[0]
        return jax.random.normal(k, shape, jnp.float32) / jnp.sqrt(fan_in)

    return {
        "w1":  w(ks[0], (n_features, feat_dim)), "b1":  jnp.zeros((1, feat_dim), jnp.float32),
        "w2":  w(ks[1], (n_features, feat_dim)), "b2":  jnp.zeros((1, feat_dim), jnp.float32),
        "wc1": w(ks[2], (n_inputs, 256)),        "bc1": 0.01 * jnp.ones((1, 256), jnp.float32),
        "wc2": w(ks[3], (256, 128)),             "bc2": 0.01 * jnp.ones((1, 128), jnp.float32),
        "wc3": w(ks[4], (128, n_outputs)),       "bc3": jnp.zeros((1, n_outputs), jnp.float32),
    }


def reference_forward(x, p, compute_dtype=jnp.bfloat16):
    """Pure-JAX reference applying the same dtype casts as the kernel."""
    cd = compute_dtype
    wf = jnp.concatenate([p["w1"], p["w2"]], axis=1).astype(cd)
    bf = jnp.concatenate([p["b1"], p["b2"]], axis=1)
    h = jnp.dot(x.astype(cd), wf, preferred_element_type=jnp.float32) + bf
    h = jnp.maximum(h, 0.0)
    h = jnp.dot(h.astype(cd), p["wc1"].astype(cd),
                preferred_element_type=jnp.float32) + p["bc1"]
    h = jnp.maximum(h, 0.0)
    h = jnp.dot(h.astype(cd), p["wc2"].astype(cd),
                preferred_element_type=jnp.float32) + p["bc2"]
    h = jnp.maximum(h, 0.0)
    return jnp.dot(h.astype(cd), p["wc3"].astype(cd),
                   preferred_element_type=jnp.float32) + p["bc3"]


if __name__ == "__main__":
    key = jax.random.PRNGKey(0)
    k_x, k_p = jax.random.split(key)

    batch = 8
    n_features = 32    # raw input feature dim
    feat_dim = 64      # each submodel's output dim -> n_inputs = 128
    n_outputs = 10

    x = jax.random.normal(k_x, (batch, n_features), jnp.float32)
    params = init_params(k_p, n_features, feat_dim, n_outputs)

    logits = ensemble_forward(x, params)
    logits = jax.block_until_ready(logits)

    ref = reference_forward(x, params)
    assert logits.shape == (batch, n_outputs)
    assert jnp.allclose(logits, ref, atol=2e-3, rtol=2e-3)

    print("KERNEL_OK")
</pallas_src>

<mosaic_0001>
module attributes {stable_mosaic.version = 11 : i64} {
  func.func @ensemble_kernel(%arg0: i32, %arg1: memref<16x32xf32, #tpu.memory_space<vmem>>, %arg2: memref<32x128xbf16, #tpu.memory_space<vmem>>, %arg3: memref<1x128xf32, #tpu.memory_space<vmem>>, %arg4: memref<128x256xbf16, #tpu.memory_space<vmem>>, %arg5: memref<1x256xf32, #tpu.memory_space<vmem>>, %arg6: memref<256x128xbf16, #tpu.memory_space<vmem>>, %arg7: memref<1x128xf32, #tpu.memory_space<vmem>>, %arg8: memref<128x128xbf16, #tpu.memory_space<vmem>>, %arg9: memref<1x128xf32, #tpu.memory_space<vmem>>, %arg10: memref<16x128xf32, #tpu.memory_space<vmem>>) attributes {dimension_semantics = [#tpu.dimension_semantics<parallel>], iteration_bounds = array<i64: 1>, scalar_prefetch = 0 : i64, scratch_operands = 0 : i64, tpu.core_type = #tpu.core_type<tc>, window_params = [{transform_indices = @transform_0, window_bounds = array<i64: 16, 32>}, {pipeline_mode = #tpu.pipeline_mode<synchronous>, transform_indices = @transform_1, window_bounds = array<i64: 32, 128>}, {pipeline_mode = #tpu.pipeline_mode<synchronous>, transform_indices = @transform_2, window_bounds = array<i64: 1, 128>}, {pipeline_mode = #tpu.pipeline_mode<synchronous>, transform_indices = @transform_3, window_bounds = array<i64: 128, 256>}, {pipeline_mode = #tpu.pipeline_mode<synchronous>, transform_indices = @transform_4, window_bounds = array<i64: 1, 256>}, {pipeline_mode = #tpu.pipeline_mode<synchronous>, transform_indices = @transform_5, window_bounds = array<i64: 256, 128>}, {pipeline_mode = #tpu.pipeline_mode<synchronous>, transform_indices = @transform_6, window_bounds = array<i64: 1, 128>}, {pipeline_mode = #tpu.pipeline_mode<synchronous>, transform_indices = @transform_7, window_bounds = array<i64: 128, 128>}, {pipeline_mode = #tpu.pipeline_mode<synchronous>, transform_indices = @transform_8, window_bounds = array<i64: 1, 128>}, {transform_indices = @transform_9, window_bounds = array<i64: 16, 128>}]} {
    %c0 = arith.constant 0 : index
    %c0_0 = arith.constant 0 : index
    %0 = vector.load %arg1[%c0, %c0_0] : memref<16x32xf32, #tpu.memory_space<vmem>>, vector<16x32xf32>
    %1 = arith.truncf %0 : vector<16x32xf32> to vector<16x32xbf16>
    %c0_1 = arith.constant 0 : index
    %c0_2 = arith.constant 0 : index
    %2 = vector.load %arg2[%c0_1, %c0_2] : memref<32x128xbf16, #tpu.memory_space<vmem>>, vector<32x128xbf16>
    %cst = arith.constant dense<0.000000e+00> : vector<16x128xf32>
    %3 = tpu.matmul %1, %2, %cst {dimension_numbers = #tpu.dot_dimension_numbers<[1], [0], [0], [1], [0, 0, 1, 1], [], []>} : vector<16x32xbf16>, vector<32x128xbf16>, vector<16x128xf32> -> vector<16x128xf32>
    %c0_3 = arith.constant 0 : index
    %c0_4 = arith.constant 0 : index
    %4 = vector.load %arg3[%c0_3, %c0_4] : memref<1x128xf32, #tpu.memory_space<vmem>>, vector<1x128xf32>
    %5 = vector.broadcast %4 : vector<1x128xf32> to vector<16x128xf32>
    %6 = arith.addf %3, %5 : vector<16x128xf32>
    %cst_5 = arith.constant 0.000000e+00 : f32
    %7 = vector.broadcast %cst_5 : f32 to vector<16x128xf32>
    %8 = arith.maximumf %6, %7 : vector<16x128xf32>
    %9 = arith.truncf %8 : vector<16x128xf32> to vector<16x128xbf16>
    %c0_6 = arith.constant 0 : index
    %c0_7 = arith.constant 0 : index
    %10 = vector.load %arg4[%c0_6, %c0_7] : memref<128x256xbf16, #tpu.memory_space<vmem>>, vector<128x256xbf16>
    %cst_8 = arith.constant dense<0.000000e+00> : vector<16x256xf32>
    %11 = tpu.matmul %9, %10, %cst_8 {dimension_numbers = #tpu.dot_dimension_numbers<[1], [0], [0], [1], [0, 0, 1, 1], [], []>} : vector<16x128xbf16>, vector<128x256xbf16>, vector<16x256xf32> -> vector<16x256xf32>
    %c0_9 = arith.constant 0 : index
    %c0_10 = arith.constant 0 : index
    %12 = vector.load %arg5[%c0_9, %c0_10] : memref<1x256xf32, #tpu.memory_space<vmem>>, vector<1x256xf32>
    %13 = vector.broadcast %12 : vector<1x256xf32> to vector<16x256xf32>
    %14 = arith.addf %11, %13 : vector<16x256xf32>
    %cst_11 = arith.constant 0.000000e+00 : f32
    %15 = vector.broadcast %cst_11 : f32 to vector<16x256xf32>
    %16 = arith.maximumf %14, %15 : vector<16x256xf32>
    %17 = arith.truncf %16 : vector<16x256xf32> to vector<16x256xbf16>
    %c0_12 = arith.constant 0 : index
    %c0_13 = arith.constant 0 : index
    %18 = vector.load %arg6[%c0_12, %c0_13] : memref<256x128xbf16, #tpu.memory_space<vmem>>, vector<256x128xbf16>
    %cst_14 = arith.constant dense<0.000000e+00> : vector<16x128xf32>
    %19 = tpu.matmul %17, %18, %cst_14 {dimension_numbers = #tpu.dot_dimension_numbers<[1], [0], [0], [1], [0, 0, 1, 1], [], []>} : vector<16x256xbf16>, vector<256x128xbf16>, vector<16x128xf32> -> vector<16x128xf32>
    %c0_15 = arith.constant 0 : index
    %c0_16 = arith.constant 0 : index
    %20 = vector.load %arg7[%c0_15, %c0_16] : memref<1x128xf32, #tpu.memory_space<vmem>>, vector<1x128xf32>
    %21 = vector.broadcast %20 : vector<1x128xf32> to vector<16x128xf32>
    %22 = arith.addf %19, %21 : vector<16x128xf32>
    %cst_17 = arith.constant 0.000000e+00 : f32
    %23 = vector.broadcast %cst_17 : f32 to vector<16x128xf32>
    %24 = arith.maximumf %22, %23 : vector<16x128xf32>
    %25 = arith.truncf %24 : vector<16x128xf32> to vector<16x128xbf16>
    %c0_18 = arith.constant 0 : index
    %c0_19 = arith.constant 0 : index
    %26 = vector.load %arg8[%c0_18, %c0_19] : memref<128x128xbf16, #tpu.memory_space<vmem>>, vector<128x128xbf16>
    %cst_20 = arith.constant dense<0.000000e+00> : vector<16x128xf32>
    %27 = tpu.matmul %25, %26, %cst_20 {dimension_numbers = #tpu.dot_dimension_numbers<[1], [0], [0], [1], [0, 0, 1, 1], [], []>} : vector<16x128xbf16>, vector<128x128xbf16>, vector<16x128xf32> -> vector<16x128xf32>
    %c0_21 = arith.constant 0 : index
    %c0_22 = arith.constant 0 : index
    %28 = vector.load %arg9[%c0_21, %c0_22] : memref<1x128xf32, #tpu.memory_space<vmem>>, vector<1x128xf32>
    %29 = vector.broadcast %28 : vector<1x128xf32> to vector<16x128xf32>
    %30 = arith.addf %27, %29 : vector<16x128xf32>
    %c0_23 = arith.constant 0 : index
    %c0_24 = arith.constant 0 : index
    %31 = vector.load %arg10[%c0_23, %c0_24] : memref<16x128xf32, #tpu.memory_space<vmem>>, vector<16x128xf32>
    tpu.vector_store %arg10[%c0_23, %c0_24], %30 {strides = array<i32>} : memref<16x128xf32, #tpu.memory_space<vmem>>, vector<16x128xf32>,
    return
  }
  func.func @transform_0(%arg0: i32) -> (i32, i32) {
    %c0_i32 = arith.constant 0 : i32
    %c0_i32_0 = arith.constant 0 : i32
    return %arg0, %c0_i32 : i32, i32
  }
  func.func @transform_1(%arg0: i32) -> (i32, i32) {
    %c0_i32 = arith.constant 0 : i32
    %c0_i32_0 = arith.constant 0 : i32
    %c0_i32_1 = arith.constant 0 : i32
    return %c0_i32, %c0_i32_0 : i32, i32
  }
  func.func @transform_2(%arg0: i32) -> (i32, i32) {
    %c0_i32 = arith.constant 0 : i32
    %c0_i32_0 = arith.constant 0 : i32
    %c0_i32_1 = arith.constant 0 : i32
    return %c0_i32, %c0_i32_0 : i32, i32
  }
  func.func @transform_3(%arg0: i32) -> (i32, i32) {
    %c0_i32 = arith.constant 0 : i32
    %c0_i32_0 = arith.constant 0 : i32
    %c0_i32_1 = arith.constant 0 : i32
    return %c0_i32, %c0_i32_0 : i32, i32
  }
  func.func @transform_4(%arg0: i32) -> (i32, i32) {
    %c0_i32 = arith.constant 0 : i32
    %c0_i32_0 = arith.constant 0 : i32
    %c0_i32_1 = arith.constant 0 : i32
    return %c0_i32, %c0_i32_0 : i32, i32
  }
  func.func @transform_5(%arg0: i32) -> (i32, i32) {
    %c0_i32 = arith.constant 0 : i32
    %c0_i32_0 = arith.constant 0 : i32
    %c0_i32_1 = arith.constant 0 : i32
    return %c0_i32, %c0_i32_0 : i32, i32
  }
  func.func @transform_6(%arg0: i32) -> (i32, i32) {
    %c0_i32 = arith.constant 0 : i32
    %c0_i32_0 = arith.constant 0 : i32
    %c0_i32_1 = arith.constant 0 : i32
    return %c0_i32, %c0_i32_0 : i32, i32
  }
  func.func @transform_7(%arg0: i32) -> (i32, i32) {
    %c0_i32 = arith.constant 0 : i32
    %c0_i32_0 = arith.constant 0 : i32
    %c0_i32_1 = arith.constant 0 : i32
    return %c0_i32, %c0_i32_0 : i32, i32
  }
  func.func @transform_8(%arg0: i32) -> (i32, i32) {
    %c0_i32 = arith.constant 0 : i32
    %c0_i32_0 = arith.constant 0 : i32
    %c0_i32_1 = arith.constant 0 : i32
    return %c0_i32, %c0_i32_0 : i32, i32
  }
  func.func @transform_9(%arg0: i32) -> (i32, i32) {
    %c0_i32 = arith.constant 0 : i32
    %c0_i32_0 = arith.constant 0 : i32
    return %arg0, %c0_i32 : i32, i32
  }
}

</mosaic_0001>

<bundles_post_ra>
// kernel: tpu_custom_call.1
= control target key start
LH: loop header
LB: loop body
LE: loop exit
PB: predicated region body
PF: predicated region fallthrough
CT: control target
= control target key end

     0   :  { %14 = vsyncpa [#allocation3], 0  ;;  %s1135_s0 = inlined_call_operand.hbm [shape: f32[16,32], index: 0, kind: input, shape index: {}]   ;;  %s1136_s1 = inlined_call_operand.hbm [shape: bf16[32,128], index: 1, kind: input, shape index: {}]   ;;  %s1137_s2 = inlined_call_operand.vmem [shape: f32[1,128], index: 2, kind: input, shape index: {}]   ;;  %s1138_s3 = inlined_call_operand.hbm [shape: bf16[128,256], index: 3, kind: input, shape index: {}]   ;;  %s1139_s4 = inlined_call_operand.vmem [shape: f32[1,256], index: 4, kind: input, shape index: {}]   ;;  %s1140_s5 = inlined_call_operand.hbm [shape: bf16[256,128], index: 5, kind: input, shape index: {}]   ;;  %s1141_s6 = inlined_call_operand.vmem [shape: f32[1,128], index: 6, kind: input, shape index: {}]   ;;  %s1142_s7 = inlined_call_operand.hbm [shape: bf16[128,128], index: 7, kind: input, shape index: {}]   ;;  %s1143_s8 = inlined_call_operand.vmem [shape: f32[1,128], index: 8, kind: input, shape index: {}]   ;;  %s1144_s9 = inlined_call_operand.hbm [shape: f32[16,128], index: 9, kind: output, shape index: {}]  }
   0x1   :  { %15 = vsyncpa [#allocation6], 0 }
   0x2   :  { %16 = vsyncpa [#allocation9], 0 }
   0x3   :  { %17 = vsyncpa [#allocation4], 0  ;;  %s956_s30 = smov [#allocation5]   ;;  %s816_s13 = scalar_lea.hbm %s1136_s1, 256 }
   0x4   :  { %s35_s10 = sshll.u32 %s956_s30, 4  ;;  %p817_p0 = scmp.ne.s32.totalorder %s1136_s1, %s816_s13  ;;  %s36_s10 = int_to_ptr.vmem [resolvable:$true] %s35_s10 }
   0x5   :  { %p820_p1 = scmp.lt.u32.totalorder %s816_s13, %s1136_s1 }
   0x7   :  { %p822_p2 = pnand %p820_p1, %p817_p0 }
   0x9   :  { %825 = shalt.err (!%p822_p2)
}
   0xa   :  { %s826_s18 = scalar_lea.vmem %s36_s10, 256  ;;  %p831_p4 = scmp.lt.s32.totalorder %s36_s10, %s36_s10 }
   0xb   :  { %p827_p3 = scmp.ne.s32.totalorder %s36_s10, %s826_s18  ;;  %p832_p5 = scmp.lt.s32.totalorder %s826_s18, %s826_s18 }
   0xd   :  { %p833_p6 = por %p832_p5, %p831_p4 }
   0xf   :  { %p834_p7 = pnand %p833_p6, %p827_p3 }
  0x11   :  { %837 = shalt.err (!%p834_p7)
}
  0x12   :  { %s957_s19 = smov 64   ;;  %s958_s20 = smov 4  }
  0x13   :  { %41 = dma.hbm_to_vmem [thread:$0]  %s1136_s1, 256, %s36_s10, [#allocation6], %s957_s19, %s957_s19, %s958_s20  }
  0x14   :  { %s959_s23 = smov [#allocation8]   ;;  %s960_s25 = smov [#allocation2]  }
  0x15   :  { %s63_s24 = sshll.u32 %s959_s23, 4  ;;  %s23_s26 = sshll.u32 %s960_s25, 4  ;;  %s64_s24 = int_to_ptr.vmem [resolvable:$true] %s63_s24  ;;  %s24_s26 = int_to_ptr.vmem [resolvable:$true] %s23_s26 }
  0x16   :  { %s838_s29 = scalar_lea.hbm %s1140_s5, 2048 }
  0x17   :  { %p839_p8 = scmp.ne.s32.totalorder %s1140_s5, %s838_s29  ;;  %p842_p9 = scmp.lt.u32.totalorder %s838_s29, %s1140_s5 }
  0x19   :  { %p844_p10 = pnand %p842_p9, %p839_p8 }
  0x1b   :  { %847 = shalt.err (!%p844_p10)
}
  0x1c   :  { %s848_s1 = scalar_lea.vmem %s64_s24, 2048  ;;  %p853_p12 = scmp.lt.s32.totalorder %s64_s24, %s64_s24 }
  0x1d   :  { %p849_p11 = scmp.ne.s32.totalorder %s64_s24, %s848_s1  ;;  %p854_p13 = scmp.lt.s32.totalorder %s848_s1, %s848_s1 }
  0x1f   :  { %p855_p0 = por %p854_p13, %p853_p12 }
  0x21   :  { %p856_p1 = pnand %p855_p0, %p849_p11 }
  0x23   :  { %859 = shalt.err (!%p856_p1)
}
  0x24   :  { %69 = dma.hbm_to_vmem [thread:$0]  %s1140_s5, 2048, %s64_s24, [#allocation9], %s957_s19, %s957_s19, %s958_s20  }
  0x25   :  { %s860_s17 = scalar_lea.hbm %s1135_s0, 256 }
  0x26   :  { %p861_p2 = scmp.ne.s32.totalorder %s1135_s0, %s860_s17  ;;  %p864_p3 = scmp.lt.u32.totalorder %s860_s17, %s1135_s0 }
  0x28   :  { %p866_p4 = pnand %p864_p3, %p861_p2 }
  0x2a   :  { %869 = shalt.err (!%p866_p4)
}
  0x2b   :  { %s870_s25 = scalar_lea.vmem %s24_s26, 256  ;;  %p875_p6 = scmp.lt.s32.totalorder %s24_s26, %s24_s26 }
  0x2c   :  { %p871_p5 = scmp.ne.s32.totalorder %s24_s26, %s870_s25  ;;  %p876_p7 = scmp.lt.s32.totalorder %s870_s25, %s870_s25 }
  0x2e   :  { %p877_p8 = por %p876_p7, %p875_p6 }
  0x30   :  { %p878_p9 = pnand %p877_p8, %p871_p5 }
  0x32   :  { %881 = shalt.err (!%p878_p9)
}
  0x33   :  { %s961_s5 = smov 128   ;;  %s962_s24 = smov 8  }
  0x34   :  { %29 = dma.hbm_to_vmem [thread:$0]  %s1135_s0, 256, %s24_s26, [#allocation3], %s961_s5, %s961_s5, %s962_s24  }
  0x35   :  { %s963_s29 = smov [#allocation7]   ;;  %s964_s11 = smov [#allocation10]  }
  0x36   :  { %s49_s30 = sshll.u32 %s963_s29, 4  ;;  %s77_s12 = sshll.u32 %s964_s11, 4  ;;  %s50_s30 = int_to_ptr.vmem [resolvable:$true] %s49_s30  ;;  %s78_s12 = int_to_ptr.vmem [resolvable:$true] %s77_s12 }
  0x37   :  { %s882_s10 = scalar_lea.hbm %s1138_s3, 2048 }
  0x38   :  { %p883_p10 = scmp.ne.s32.totalorder %s1138_s3, %s882_s10  ;;  %p886_p11 = scmp.lt.u32.totalorder %s882_s10, %s1138_s3 }
  0x3a   :  { %p888_p12 = pnand %p886_p11, %p883_p10 }
  0x3c   :  { %891 = shalt.err (!%p888_p12)
}
  0x3d   :  { %s892_s0 = scalar_lea.vmem %s50_s30, 2048  ;;  %p897_p0 = scmp.lt.s32.totalorder %s50_s30, %s50_s30 }
  0x3e   :  { %p893_p13 = scmp.ne.s32.totalorder %s50_s30, %s892_s0  ;;  %p898_p1 = scmp.lt.s32.totalorder %s892_s0, %s892_s0 }
  0x40   :  { %p899_p2 = por %p898_p1, %p897_p0 }
  0x42   :  { %p900_p3 = pnand %p899_p2, %p893_p13 }
  0x44   :  { %903 = shalt.err (!%p900_p3)
}
  0x45   :  { %55 = dma.hbm_to_vmem [thread:$0]  %s1138_s3, 2048, %s50_s30, [#allocation6], %s961_s5, %s961_s5, %s962_s24  }
  0x46   :  { %s904_s23 = scalar_lea.hbm %s1142_s7, 1024 }
  0x47   :  { %p905_p4 = scmp.ne.s32.totalorder %s1142_s7, %s904_s23  ;;  %p908_p5 = scmp.lt.u32.totalorder %s904_s23, %s1142_s7 }
  0x49   :  { %p910_p6 = pnand %p908_p5, %p905_p4 }
  0x4b   :  { %913 = shalt.err (!%p910_p6)
}
  0x4c   :  { %s914_s11 = scalar_lea.vmem %s78_s12, 1024  ;;  %p919_p8 = scmp.lt.s32.totalorder %s78_s12, %s78_s12 }
  0x4d   :  { %p915_p7 = scmp.ne.s32.totalorder %s78_s12, %s914_s11  ;;  %p920_p9 = scmp.lt.s32.totalorder %s914_s11, %s914_s11 }
  0x4f   :  { %p921_p10 = por %p920_p9, %p919_p8 }
  0x51   :  { %p922_p11 = pnand %p921_p10, %p915_p7 }
  0x53   :  { %925 = shalt.err (!%p922_p11)
}
  0x54   :  { %83 = dma.hbm_to_vmem [thread:$0]  %s1142_s7, 1024, %s78_s12, [#allocation9], %s957_s19, %s957_s19, %s958_s20  }
  0x55   :  { %948 = dma.done.wait [#allocation3], 256  }
  0x56   :  { %949 = vsyncadd [#allocation3], 4294967040 }
  0x57   :  { %950 = dma.done.wait [#allocation6], 2304  }
  0x58   :  { %951 = vsyncadd [#allocation6], 4294964992 }
  0x59   :  { %952 = dma.done.wait [#allocation9], 3072  }
  0x5a   :  { %953 = vsyncadd [#allocation9], 4294964224  ;;  %v965_v0 = vmov 0.0   ;;  %vm966_vm0 = vmmov 0   ;;  %v766_v1 = vld [vmem:[#allocation5] sm:$0xff]   ;;  %v767_v2 = vld [vmem:[#allocation5 + $0x8] sm:$0xff]   ;;  %v194_v54 = vlaneseq }
  0x5b   :  { %725 = vmatprep.subr.bf16.mxu0 %v965_v0  ;;  %729 = vmatprep.mubr.msk.bf16.mxu0 %vm966_vm0, %v965_v0  ;;  %v102_v3 = vld [vmem:[#allocation2] sm:$0xff]  ;;  %v103_v4 = vld [vmem:[#allocation2 + $0x8] sm:$0xff]  ;;  %v771_v7 = vld [vmem:[#allocation7 + $0x14] ss:$8 sps:$4 sm:$0xff]   ;;  %vm128_vm1 = vcmask 261120   ;;  %v967_v22 = vmov 0  }
  0x5c   :  { %726 = vmatpush3.bf16.msra.mxu0 %v766_v1  ;;  %v768_v5 = vld [vmem:[#allocation7 + $0x4] ss:$8 sps:$4 sm:$0xff]   ;;  %v770_v6 = vld [vmem:[#allocation7] ss:$8 sps:$4 sm:$0xff]   ;;  %v104_v8 = vpack.c.bf16 %v103_v4, %v102_v3  ;;  %v773_v9 = vld [vmem:[#allocation7 + $0x10] ss:$8 sps:$4 sm:$0xff]   ;;  %316 = vmatprep.mubr.bf16.mxu1 %v967_v22 }
  0x5d   :  { %727 = vmatprep.subr.bf16.mxu0 %v965_v0  ;;  %284 = vmatprep.subr.bf16.mxu1 %v768_v5  ;;  %v774_v10 = vld [vmem:[#allocation7 + $0x24] ss:$8 sps:$4 sm:$0xff]   ;;  %v776_v11 = vld [vmem:[#allocation7 + $0x20] ss:$8 sps:$4 sm:$0xff]   ;;  %v777_v12 = vld [vmem:[#allocation7 + $0x34] ss:$8 sps:$4 sm:$0xff]  }
  0x5e   :  { %285 = vmatpush1.bf16.msra.mxu1 %v770_v6  ;;  %v779_v13 = vld [vmem:[#allocation7 + $0x30] ss:$8 sps:$4 sm:$0xff]   ;;  %v780_v14 = vld [vmem:[#allocation7 + $0x44] ss:$8 sps:$4 sm:$0xff]   ;;  %v782_v15 = vld [vmem:[#allocation7 + $0x40] ss:$8 sps:$4 sm:$0xff]  }
  0x5f   :  { %286 = vmatprep.subr.bf16.mxu1 %v771_v7  ;;  %v783_v16 = vld [vmem:[#allocation7 + $0x54] ss:$8 sps:$4 sm:$0xff]   ;;  %v785_v17 = vld [vmem:[#allocation7 + $0x50] ss:$8 sps:$4 sm:$0xff]   ;;  %v786_v18 = vld [vmem:[#allocation7 + $0x64] ss:$8 sps:$4 sm:$0xff]  }
  0x60   :  { %728 = vmatpush3.bf16.msra.mxu0 %v767_v2  ;;  %v788_v19 = vld [vmem:[#allocation7 + $0x60] ss:$8 sps:$4 sm:$0xff]   ;;  %v789_v20 = vld [vmem:[#allocation7 + $0x74] ss:$8 sps:$4 sm:$0xff]   ;;  %v791_v21 = vld [vmem:[#allocation7 + $0x70] ss:$8 sps:$4 sm:$0xff]  }
  0x61   :  { %v792_v23 = vld [vmem:[#allocation8 + $0x40] sm:$0xff]   ;;  %v794_v25 = vld [vmem:[#allocation8 + $0x48] sm:$0xff]   ;;  %v796_v27 = vld [vmem:[#allocation8 + $0x50] sm:$0xff]   ;;  %v195_v55 = vshrl.u32 %v194_v54, 7  ;;  %s968_s10 = smov [#allocation11]  }
  0x62   :  { %287 = vmatpush1.bf16.msra.mxu1 %v773_v9  ;;  %v793_v24 = vld [vmem:[#allocation8] sm:$0xff]   ;;  %694 = vmatprep.subr.bf16.mxu0 %v792_v23  ;;  %v795_v26 = vld [vmem:[#allocation8 + $0x8] sm:$0xff]   ;;  %v797_v28 = vld [vmem:[#allocation8 + $0x10] sm:$0xff]   ;;  %s631_s14 = sshll.u32 %s968_s10, 4  ;;  %s632_s14 = int_to_ptr.vmem [resolvable:$true] %s631_s14 }
  0x63   :  { %730 = vmatmul.mubr.msk.bf16.vlgmr.msra.gmra.mrb[0].mxu0 %vm128_vm1, %v104_v8  ;;  %288 = vmatprep.subr.bf16.mxu1 %v774_v10  ;;  %v798_v29 = vld [vmem:[#allocation8 + $0x58] sm:$0xff]   ;;  %v800_v31 = vld [vmem:[#allocation8 + $0x60] sm:$0xff]   ;;  %v802_v33 = vld [vmem:[#allocation8 + $0x68] sm:$0xff]   ;;  %v196_v56 = vsub.s32 0, %v195_v55  ;;  %v200_v58 = vsub.s32 1, %v195_v55  ;;  %p931_p13 = scmp.lt.s32.totalorder %s632_s14, %s632_s14 }
  0x64   :  { %695 = vmatpush3.bf16.msra.mxu0 %v793_v24  ;;  %v799_v30 = vld [vmem:[#allocation8 + $0x18] sm:$0xff]   ;;  %v801_v32 = vld [vmem:[#allocation8 + $0x20] sm:$0xff]   ;;  %v803_v44 = vld [vmem:[#allocation8 + $0x28] sm:$0xff]  }
  0x65   :  { %696 = vmatprep.subr.bf16.mxu0 %v794_v25  ;;  %v645_v34 = vld [vmem:[%s1137_s2] ss:$0 sm:$0xff]  ;;  %v804_v45 = vld [vmem:[#allocation8 + $0x70] sm:$0xff]   ;;  %v806_v47 = vld [vmem:[#allocation8 + $0x78] sm:$0xff]  }
  0x66   :  { %289 = vmatpush1.bf16.msra.mxu1 %v776_v11  ;;  %v805_v46 = vld [vmem:[#allocation8 + $0x30] sm:$0xff]   ;;  %v807_v48 = vld [vmem:[#allocation8 + $0x38] sm:$0xff]   ;;  %v808_v49 = vld [vmem:[#allocation10] sm:$0xff]  }
  0x67   :  { %290 = vmatprep.subr.bf16.mxu1 %v777_v12  ;;  %v809_v50 = vld [vmem:[#allocation10 + $0x8] sm:$0xff]   ;;  %v810_v51 = vld [vmem:[#allocation10 + $0x10] sm:$0xff]   ;;  %v811_v52 = vld [vmem:[#allocation10 + $0x18] sm:$0xff]  }
  0x68   :  { %697 = vmatpush3.bf16.msra.mxu0 %v795_v26  ;;  %v812_v53 = vld [vmem:[#allocation10 + $0x20] sm:$0xff]   ;;  %v813_v12 = vld [vmem:[#allocation10 + $0x28] sm:$0xff]  }
  0x69   :  { %698 = vmatprep.subr.bf16.mxu0 %v796_v27  ;;  %v192_v57 = vld [vmem:[%s1139_s4] sm:$0x3] }
  0x6a   :  { %291 = vmatpush1.bf16.msra.mxu1 %v779_v13  ;;  %v197_v59 = vrot.slane %v192_v57, %v196_v56  ;;  %v201_v60 = vrot.slane %v192_v57, %v200_v58  ;;  %v814_v13 = vld [vmem:[#allocation10 + $0x30] sm:$0xff]  }
  0x6b   :  { %292 = vmatprep.subr.bf16.mxu1 %v780_v14  ;;  %v815_v14 = vld [vmem:[#allocation10 + $0x38] sm:$0xff]  }
  0x6c   :  { %699 = vmatpush3.bf16.msra.mxu0 %v797_v28 }
  0x6d   :  { %700 = vmatprep.subr.bf16.mxu0 %v798_v29 }
  0x6e   :  { %293 = vmatpush1.bf16.msra.mxu1 %v782_v15 }
  0x6f   :  { %294 = vmatprep.subr.bf16.mxu1 %v783_v16  ;;  %v665_v16 = vld [vmem:[%s1141_s6] ss:$0 sm:$0xff]  ;;  %s926_s6 = scalar_lea.vmem %s632_s14, 256 }
  0x70   :  { %701 = vmatpush3.bf16.msra.mxu0 %v799_v30  ;;  %p927_p12 = scmp.ne.s32.totalorder %s632_s14, %s926_s6  ;;  %p932_p0 = scmp.lt.s32.totalorder %s926_s6, %s926_s6 }
  0x71   :  { %702 = vmatprep.subr.bf16.mxu0 %v800_v31 }
  0x72   :  { %295 = vmatpush1.bf16.msra.mxu1 %v785_v17  ;;  %p933_p1 = por %p932_p0, %p931_p13 }
  0x73   :  { %296 = vmatprep.subr.bf16.mxu1 %v786_v18 }
  0x74   :  { %703 = vmatpush3.bf16.msra.mxu0 %v801_v32  ;;  %p934_p2 = pnand %p933_p1, %p927_p12 }
  0x75   :  { %704 = vmatprep.subr.bf16.mxu0 %v802_v33 }
  0x76   :  { %297 = vmatpush1.bf16.msra.mxu1 %v788_v19 }
  0x77   :  { %298 = vmatprep.subr.bf16.mxu1 %v789_v20 }
  0x78   :  { %705 = vmatpush3.bf16.msra.mxu0 %v803_v44 }
  0x79   :  { %706 = vmatprep.subr.bf16.mxu0 %v804_v45 }
  0x7a   :  { %299 = vmatpush1.bf16.msra.mxu1 %v791_v21 }
  0x7b   :  { %733 = vmatprep.subr.bf16.mxu1 %v965_v0 }
  0x7c   :  { %707 = vmatpush3.bf16.msra.mxu0 %v805_v46 }
  0x7d   :  { %708 = vmatprep.subr.bf16.mxu0 %v806_v47 }
  0x80   :  { %709 = vmatpush3.bf16.msra.mxu0 %v807_v48 }
 0x136   :  { %v166_v35 = vpop.f32.mrb[0].mxu0 }
 0x137   :  { %v167_v36 = vadd.f32 %v645_v34, %v166_v35  ;;  %v731_v37 = vpop.f32.mrb[1].mxu0 }
 0x138   :  { %v169_v38 = vpop.f32.mrb[2].mxu0 }
 0x139   :  { %v170_v39 = vadd.f32 %v645_v34, %v169_v38  ;;  %v732_v40 = vpop.f32.mrb[3].mxu0  ;;  %v173_v41 = vmax.f32 %v167_v36, 0.0 }
 0x13b   :  { %v174_v42 = vmax.f32 %v170_v39, 0.0 }
 0x13d   :  { %v175_v43 = vpack.c.bf16 %v174_v42, %v173_v41 }
 0x13f   :  { %317 = vmatmul.mubr.bf16.vlgmr.msra.gmra.mrb[0].mxu1 %v175_v43 }
 0x140   :  { %749 = vmatprep.mubr.msk.bf16.mxu1 %vm966_vm0, %v965_v0  ;;  %734 = vmatpush3.bf16.msra.mxu1 %v808_v49 }
 0x141   :  { %735 = vmatprep.subr.bf16.mxu1 %v965_v0 }
 0x144   :  { %736 = vmatpush3.bf16.msra.mxu1 %v809_v50 }
 0x145   :  { %737 = vmatprep.subr.bf16.mxu1 %v965_v0 }
 0x148   :  { %738 = vmatpush3.bf16.msra.mxu1 %v810_v51 }
 0x149   :  { %739 = vmatprep.subr.bf16.mxu1 %v965_v0 }
 0x14c   :  { %740 = vmatpush3.bf16.msra.mxu1 %v811_v52 }
 0x14d   :  { %741 = vmatprep.subr.bf16.mxu1 %v965_v0 }
 0x150   :  { %742 = vmatpush3.bf16.msra.mxu1 %v812_v53 }
 0x151   :  { %743 = vmatprep.subr.bf16.mxu1 %v965_v0 }
 0x154   :  { %744 = vmatpush3.bf16.msra.mxu1 %v813_v12 }
 0x155   :  { %745 = vmatprep.subr.bf16.mxu1 %v965_v0 }
 0x158   :  { %746 = vmatpush3.bf16.msra.mxu1 %v814_v13 }
 0x159   :  { %747 = vmatprep.subr.bf16.mxu1 %v965_v0  ;;  %v682_v0 = vld [vmem:[%s1143_s8] ss:$0 sm:$0xff] }
 0x15c   :  { %748 = vmatpush3.bf16.msra.mxu1 %v815_v14 }
 0x212   :  { %v318_v61 = vpop.f32.mrb[0].mxu1 }
 0x213   :  { %v319_v62 = vadd.f32 %v318_v61, %v197_v59  ;;  %v320_v63 = vpop.f32.mrb[1].mxu1 }
 0x214   :  { %v321_v1 = vadd.f32 %v320_v63, %v201_v60  ;;  %v322_v2 = vpop.f32.mrb[2].mxu1 }
 0x215   :  { %v323_v3 = vadd.f32 %v322_v2, %v197_v59  ;;  %v324_v4 = vpop.f32.mrb[3].mxu1  ;;  %v327_v6 = vmax.f32 %v319_v62, 0.0 }
 0x216   :  { %v325_v5 = vadd.f32 %v324_v4, %v201_v60  ;;  %v328_v8 = vmax.f32 %v321_v1, 0.0 }
 0x217   :  { %v329_v7 = vmax.f32 %v323_v3, 0.0 }
 0x218   :  { %v330_v9 = vmax.f32 %v325_v5, 0.0 }
 0x219   :  { %v331_v10 = vpack.c.bf16 %v329_v7, %v327_v6 }
 0x21a   :  { %v332_v11 = vpack.c.bf16 %v330_v9, %v328_v8 }
 0x21c   :  { %500 = vmatprep.mubr.bf16.mxu0 %v332_v11 }
 0x21d   :  { %501 = vmatmul.mubr.bf16.vlgmr.msra.gmra.mrb[4].mxu0 %v331_v10 }
 0x2f0   :  { %v710_v15 = vpop.f32.mrb[4].mxu0 }
 0x2f1   :  { %v711_v17 = vpop.f32.mrb[5].mxu0 }
 0x2f2   :  { %v712_v18 = vadd.f32 %v711_v17, %v710_v15  ;;  %v713_v19 = vpop.f32.mrb[6].mxu0 }
 0x2f3   :  { %v714_v20 = vpop.f32.mrb[7].mxu0 }
 0x2f4   :  { %v503_v21 = vadd.f32 %v712_v18, %v665_v16  ;;  %v715_v22 = vadd.f32 %v714_v20, %v713_v19 }
 0x2f6   :  { %v506_v23 = vadd.f32 %v715_v22, %v665_v16  ;;  %v509_v24 = vmax.f32 %v503_v21, 0.0 }
 0x2f8   :  { %v510_v25 = vmax.f32 %v506_v23, 0.0 }
 0x2fa   :  { %v511_v26 = vpack.c.bf16 %v510_v25, %v509_v24 }
 0x2fc   :  { %750 = vmatmul.mubr.bf16.vlgmr.msra.gmra.mrb[4].mxu1 %v511_v26 }
 0x3cf   :  { %v617_v27 = vpop.f32.mrb[4].mxu1 }
 0x3d0   :  { %v618_v28 = vadd.f32 %v682_v0, %v617_v27  ;;  %v751_v29 = vpop.f32.mrb[5].mxu1 }
 0x3d1   :  { %v620_v30 = vpop.f32.mrb[6].mxu1 }
 0x3d2   :  { %624 = vst [vmem:[#allocation11] sm:$0xff] %v618_v28  ;;  %v621_v31 = vadd.f32 %v682_v0, %v620_v30  ;;  %v752_v32 = vpop.f32.mrb[7].mxu1 }
 0x3d4   :  { %625 = vst [vmem:[#allocation11 + $0x8] sm:$0xff] %v621_v31 }
 0x3d5   :  { %937 = shalt.err (!%p934_p2)
}
 0x3d6   :  { %s938_s16 = scalar_lea.hbm %s1144_s9, 256 }
 0x3d7   :  { %p939_p3 = scmp.ne.s32.totalorder %s1144_s9, %s938_s16  ;;  %p942_p4 = scmp.lt.u32.totalorder %s938_s16, %s1144_s9 }
 0x3d9   :  { %p944_p5 = pnand %p942_p4, %p939_p3 }
 0x3db   :  { %947 = shalt.err (!%p944_p5)
}
 0x3dc   :  { %637 = dma.vmem_to_hbm [thread:$0]  %s632_s14, 256, %s1144_s9, [#allocation4], %s961_s5, %s961_s5, %s962_s24  }
 0x3dd   :  { %954 = dma.done.wait [#allocation4], 256  }
 0x3de   :  { %955 = vsyncadd [#allocation4], 4294967040 }
 0x3df   :  { %641 = vsyncpa [#allocation3], 1 }
 0x3e0   :  { %642 = vsyncpa [#allocation6], 1 }
 0x3e1   :  { %643 = vsyncpa [#allocation9], 1 }
 0x3e2   :  { %644 = vsyncpa [#allocation4], 1 }

</bundles_post_ra>
